<compile_context>
chip_gen: v5e
topology: v5e:2x2
jax: 0.10.0
libtpu: 0.0.40
codegen_flags: <defaults>
</compile_context>

<pallas_src>
import functools

import jax
import jax.numpy as jnp
from jax import lax
from jax.experimental import pallas as pl
from jax.experimental.pallas import tpu as pltpu


def _cross_attn_kernel(x_ref, ctx_ref, wq_ref, wk_ref, wv_ref, wo_ref, bo_ref,
                       o_ref, q_sc, k_sc, v_sc, out_sc, *,
                       heads, dim_head, scale, cache_kv):
    def compute_kv():
        ctx = ctx_ref[0]                                            # (Nc, Dc) bf16
        k_sc[...] = jnp.dot(ctx, wk_ref[...],
                            preferred_element_type=jnp.float32).astype(k_sc.dtype)
        v_sc[...] = jnp.dot(ctx, wv_ref[...],
                            preferred_element_type=jnp.float32).astype(v_sc.dtype)

    if cache_kv:
        # q-tile axis is the inner grid axis and marked "arbitrary": the K/V
        # slabs computed at q-tile 0 stay valid for the rest of this batch.
        pl.when(pl.program_id(1) == 0)(compute_kv)
    else:
        compute_kv()

    # Q projection for this q-tile: wide matmul for ALL heads, fold 1/sqrt(d),
    # cast straight into the bf16 scratch slab (no f32 slab kept live).
    q_sc[...] = (jnp.dot(x_ref[0], wq_ref[...],
                         preferred_element_type=jnp.float32)
                 * scale).astype(q_sc.dtype)

    for h in range(heads):
        lo = h * dim_head
        hi = lo + dim_head
        qh = q_sc[:, lo:hi]                                         # (tq, d) bf16
        kh = k_sc[:, lo:hi]                                         # (Nc, d) bf16
        vh = v_sc[:, lo:hi]                                         # (Nc, d) bf16

        # sim = qh @ kh.T without materializing a transpose through the XLU.
        sim = lax.dot_general(
            qh, kh, dimension_numbers=(((1,), (1,)), ((), ())),
            preferred_element_type=jnp.float32)                     # (tq, Nc) f32

        # Numerically stable softmax kept in f32 (v5e has no bf16 VPU/EUP).
        # TODO(synk): on v6e/v7x, if the EUP slot shows saturated in the
        # bundle dump, exp could run on bf16 inputs for ~2x throughput.
        m = jnp.max(sim, axis=-1, keepdims=True)
        p = jnp.exp(sim - m)
        l = jnp.sum(p, axis=-1, keepdims=True)
        oh = jnp.dot(p.astype(vh.dtype), vh,
                     preferred_element_type=jnp.float32)            # (tq, d) f32
        # Fold the softmax denominator (EUP approximate reciprocal) and write
        # this head's result straight into its lane range of the bf16 slab.
        out_sc[:, lo:hi] = (oh * pl.reciprocal(l, approx=True)).astype(out_sc.dtype)

    # Single to_out Linear with K = H*d; bias added exactly once, in f32.
    y = jnp.dot(out_sc[...], wo_ref[...],
                preferred_element_type=jnp.float32) + bo_ref[...]   # (tq, Dq)
    o_ref[0] = y.astype(o_ref.dtype)


def _pick_tile_and_vmem():
    """Per-generation q-tile cap and VMEM limit (128 MiB parts vs 64 MiB v7x)."""
    try:
        vmem_bytes = pltpu.get_tpu_info().vmem_capacity_bytes
    except Exception:  # pragma: no cover - be conservative if query fails
        vmem_bytes = 64 * 1024 * 1024
    if vmem_bytes >= 100 * 1024 * 1024:      # v5e / v6e: 128 MiB per TensorCore
        return 512, 96 * 1024 * 1024
    return 256, 48 * 1024 * 1024             # v7x: 64 MiB per TensorCore


def cross_attention(x, context, params, *, heads, dim_head, tile_q=None):
    """x: (B, Nq, Dq), context: (B, Nc, Dc) -> (B, Nq, Dq)."""
    B, Nq, Dq = x.shape
    _, Nc, Dc = context.shape
    d = dim_head
    H = heads
    inner = H * d
    scale = d ** (-0.5)

    tile_cap, vmem_limit = _pick_tile_and_vmem()
    if tile_q is None:
        tile_q = Nq if Nq <= tile_cap else tile_cap
    assert Nq % tile_q == 0, (Nq, tile_q)
    n_qt = Nq // tile_q

    # K/V caching needs the q-tile axis to be "arbitrary".  Only give up that
    # axis's parallelism when the batch axis (or a single q-tile) still keeps
    # both v7x TensorCores busy / the caching is free.
    cache_kv = (B >= 2) or (n_qt == 1)
    q_axis_sem = "arbitrary" if (cache_kv and n_qt > 1) else "parallel"

    # bf16 matmul inputs, f32 accumulation inside the kernel.
    cdt = jnp.bfloat16
    xb = x.astype(cdt)
    ctxb = context.astype(cdt)
    wq = params["wq"].astype(cdt)          # (Dq, H*d)
    wk = params["wk"].astype(cdt)          # (Dc, H*d)
    wv = params["wv"].astype(cdt)          # (Dc, H*d)
    wo = params["wo"].astype(cdt)          # (H*d, Dq)
    bo = params["bo"].reshape(1, Dq).astype(jnp.float32)

    kernel = functools.partial(_cross_attn_kernel, heads=H, dim_head=d,
                               scale=scale, cache_kv=cache_kv)

    # Constant-index operands: fetched once, kept VMEM-resident, and
    # single-buffered (default double-buffering would only waste VMEM).
    single = dict(pipeline_mode=pl.Buffered(1))

    # NOTE: for production use, Dq / Dc / H*d (and ideally dim_head) should be
    # multiples of 128 so the output writeback avoids masked partial stores.
    return pl.pallas_call(
        kernel,
        out_shape=jax.ShapeDtypeStruct((B, Nq, Dq), x.dtype),
        grid_spec=pltpu.PrefetchScalarGridSpec(
            num_scalar_prefetch=0,
            grid=(B, n_qt),
            in_specs=[
                pl.BlockSpec((1, tile_q, Dq), lambda b, i: (b, i, 0)),   # x tile
                pl.BlockSpec((1, Nc, Dc), lambda b, i: (b, 0, 0)),       # context
                pl.BlockSpec((Dq, inner), lambda b, i: (0, 0), **single),  # Wq
                pl.BlockSpec((Dc, inner), lambda b, i: (0, 0), **single),  # Wk
                pl.BlockSpec((Dc, inner), lambda b, i: (0, 0), **single),  # Wv
                pl.BlockSpec((inner, Dq), lambda b, i: (0, 0), **single),  # Wout
                pl.BlockSpec((1, Dq), lambda b, i: (0, 0), **single),      # bias
            ],
            out_specs=pl.BlockSpec((1, tile_q, Dq), lambda b, i: (b, i, 0)),
            scratch_shapes=[
                pltpu.VMEM((tile_q, inner), cdt),   # q slab (bf16, scaled)
                pltpu.VMEM((Nc, inner), cdt),       # k slab (bf16, per batch)
                pltpu.VMEM((Nc, inner), cdt),       # v slab (bf16, per batch)
                pltpu.VMEM((tile_q, inner), cdt),   # per-head output slab
            ],
        ),
        compiler_params=pltpu.CompilerParams(
            dimension_semantics=("parallel", q_axis_sem),
            vmem_limit_bytes=vmem_limit),
    )(xb, ctxb, wq, wk, wv, wo, bo)


def cross_attention_ref(x, context, params, *, heads, dim_head):
    """Pure-JAX f32 reference matching the PyTorch forward (dropout=0 / eval)."""
    B, Nq, Dq = x.shape
    _, Nc, Dc = context.shape
    H, d = heads, dim_head
    scale = d ** (-0.5)

    q = x @ params["wq"]            # (B, Nq, H*d)
    k = context @ params["wk"]      # (B, Nc, H*d)
    v = context @ params["wv"]      # (B, Nc, H*d)

    def split(t, n):
        return t.reshape(B, n, H, d).transpose(0, 2, 1, 3)   # (B, H, n, d)

    q, k, v = split(q, Nq), split(k, Nc), split(v, Nc)
    sim = jnp.einsum("bhid,bhjd->bhij", q, k) * scale
    attn = jax.nn.softmax(sim, axis=-1)
    out = jnp.einsum("bhij,bhjd->bhid", attn, v)             # (B, H, Nq, d)
    out = out.transpose(0, 2, 1, 3).reshape(B, Nq, H * d)
    return out @ params["wo"] + params["bo"]


if __name__ == "__main__":
    # Small, deterministic synthetic setup.
    B, Nq, Nc = 2, 16, 8
    query_dim, context_dim = 32, 24
    heads, dim_head = 4, 16
    inner_dim = heads * dim_head

    key = jax.random.PRNGKey(0)
    kx, kc, k1, k2, k3, k4, k5 = jax.random.split(key, 7)

    x = jax.random.normal(kx, (B, Nq, query_dim), dtype=jnp.float32)
    context = jax.random.normal(kc, (B, Nc, context_dim), dtype=jnp.float32)

    params = {
        "wq": 0.1 * jax.random.normal(k1, (query_dim, inner_dim), jnp.float32),
        "wk": 0.1 * jax.random.normal(k2, (context_dim, inner_dim), jnp.float32),
        "wv": 0.1 * jax.random.normal(k3, (context_dim, inner_dim), jnp.float32),
        "wo": 0.1 * jax.random.normal(k4, (inner_dim, query_dim), jnp.float32),
        "bo": 0.1 * jax.random.normal(k5, (query_dim,), jnp.float32),
    }

    out = cross_attention(x, context, params, heads=heads, dim_head=dim_head)
    out = jax.block_until_ready(out)

    ref = cross_attention_ref(x, context, params, heads=heads, dim_head=dim_head)
    assert out.shape == (B, Nq, query_dim), out.shape
    # Tolerance loosened vs. pure-f32: matmul inputs are bf16 and the softmax
    # denominator uses the approximate EUP reciprocal.
    assert jnp.allclose(out, ref, rtol=3e-2, atol=3e-2), float(
        jnp.max(jnp.abs(out - ref)))

    # TODO(synk): nn.Dropout in to_out is identity in eval mode (dropout=0.0),
    # so it is intentionally not modeled in the kernel.
    print("KERNEL_OK")
</pallas_src>

<mosaic_0001>
module attributes {stable_mosaic.version = 11 : i64} {
  func.func @_cross_attn_kernel(%arg0: i32, %arg1: i32, %arg2: memref<1x16x32xbf16, #tpu.memory_space<vmem>>, %arg3: memref<1x8x24xbf16, #tpu.memory_space<vmem>>, %arg4: memref<32x64xbf16, #tpu.memory_space<vmem>>, %arg5: memref<24x64xbf16, #tpu.memory_space<vmem>>, %arg6: memref<24x64xbf16, #tpu.memory_space<vmem>>, %arg7: memref<64x32xbf16, #tpu.memory_space<vmem>>, %arg8: memref<1x32xf32, #tpu.memory_space<vmem>>, %arg9: memref<1x16x32xf32, #tpu.memory_space<vmem>>, %arg10: memref<16x64xbf16, #tpu.memory_space<vmem>>, %arg11: memref<8x64xbf16, #tpu.memory_space<vmem>>, %arg12: memref<8x64xbf16, #tpu.memory_space<vmem>>, %arg13: memref<16x64xbf16, #tpu.memory_space<vmem>>) attributes {dimension_semantics = [#tpu.dimension_semantics<parallel>, #tpu.dimension_semantics<parallel>], iteration_bounds = array<i64: 2, 1>, scalar_prefetch = 0 : i64, scratch_operands = 4 : i64, tpu.core_type = #tpu.core_type<tc>, window_params = [{transform_indices = @transform_0, window_bounds = array<i64: 1, 16, 32>}, {transform_indices = @transform_1, window_bounds = array<i64: 1, 8, 24>}, {pipeline_mode = #tpu.pipeline_mode<synchronous>, transform_indices = @transform_2, window_bounds = array<i64: 32, 64>}, {pipeline_mode = #tpu.pipeline_mode<synchronous>, transform_indices = @transform_3, window_bounds = array<i64: 24, 64>}, {pipeline_mode = #tpu.pipeline_mode<synchronous>, transform_indices = @transform_4, window_bounds = array<i64: 24, 64>}, {pipeline_mode = #tpu.pipeline_mode<synchronous>, transform_indices = @transform_5, window_bounds = array<i64: 64, 32>}, {pipeline_mode = #tpu.pipeline_mode<synchronous>, transform_indices = @transform_6, window_bounds = array<i64: 1, 32>}, {transform_indices = @transform_7, window_bounds = array<i64: 1, 16, 32>}]} {
    %c0_i32 = arith.constant 0 : i32
    %0 = arith.cmpi eq, %arg1, %c0_i32 : i32
    %1 = arith.extui %0 : i1 to i32
    %c0_i32_0 = arith.constant 0 : i32
    %2 = arith.cmpi ne, %1, %c0_i32_0 : i32
    scf.if %2 {
      %c0_63 = arith.constant 0 : index
      %c0_64 = arith.constant 0 : index
      %c0_65 = arith.constant 0 : index
      %92 = vector.load %arg3[%c0_63, %c0_64, %c0_65] : memref<1x8x24xbf16, #tpu.memory_space<vmem>>, vector<1x8x24xbf16>
      %93 = vector.shape_cast %92 : vector<1x8x24xbf16> to vector<8x24xbf16>
      %c0_66 = arith.constant 0 : index
      %c0_67 = arith.constant 0 : index
      %94 = vector.load %arg5[%c0_66, %c0_67] : memref<24x64xbf16, #tpu.memory_space<vmem>>, vector<24x64xbf16>
      %cst_68 = arith.constant dense<0.000000e+00> : vector<8x64xf32>
      %95 = tpu.matmul %93, %94, %cst_68 {dimension_numbers = #tpu.dot_dimension_numbers<[1], [0], [0], [1], [0, 0, 1, 1], [], []>} : vector<8x24xbf16>, vector<24x64xbf16>, vector<8x64xf32> -> vector<8x64xf32>
      %96 = arith.truncf %95 : vector<8x64xf32> to vector<8x64xbf16>
      %c0_69 = arith.constant 0 : index
      %c0_70 = arith.constant 0 : index
      %97 = vector.load %arg11[%c0_69, %c0_70] : memref<8x64xbf16, #tpu.memory_space<vmem>>, vector<8x64xbf16>
      tpu.vector_store %arg11[%c0_69, %c0_70], %96 {strides = array<i32>} : memref<8x64xbf16, #tpu.memory_space<vmem>>, vector<8x64xbf16>,
      %c0_71 = arith.constant 0 : index
      %c0_72 = arith.constant 0 : index
      %98 = vector.load %arg6[%c0_71, %c0_72] : memref<24x64xbf16, #tpu.memory_space<vmem>>, vector<24x64xbf16>
      %cst_73 = arith.constant dense<0.000000e+00> : vector<8x64xf32>
      %99 = tpu.matmul %93, %98, %cst_73 {dimension_numbers = #tpu.dot_dimension_numbers<[1], [0], [0], [1], [0, 0, 1, 1], [], []>} : vector<8x24xbf16>, vector<24x64xbf16>, vector<8x64xf32> -> vector<8x64xf32>
      %100 = arith.truncf %99 : vector<8x64xf32> to vector<8x64xbf16>
      %c0_74 = arith.constant 0 : index
      %c0_75 = arith.constant 0 : index
      %101 = vector.load %arg12[%c0_74, %c0_75] : memref<8x64xbf16, #tpu.memory_space<vmem>>, vector<8x64xbf16>
      tpu.vector_store %arg12[%c0_74, %c0_75], %100 {strides = array<i32>} : memref<8x64xbf16, #tpu.memory_space<vmem>>, vector<8x64xbf16>,
    } else {
    }
    %c0 = arith.constant 0 : index
    %c0_1 = arith.constant 0 : index
    %c0_2 = arith.constant 0 : index
    %3 = vector.load %arg2[%c0, %c0_1, %c0_2] : memref<1x16x32xbf16, #tpu.memory_space<vmem>>, vector<1x16x32xbf16>
    %4 = vector.shape_cast %3 : vector<1x16x32xbf16> to vector<16x32xbf16>
    %c0_3 = arith.constant 0 : index
    %c0_4 = arith.constant 0 : index
    %5 = vector.load %arg4[%c0_3, %c0_4] : memref<32x64xbf16, #tpu.memory_space<vmem>>, vector<32x64xbf16>
    %cst = arith.constant dense<0.000000e+00> : vector<16x64xf32>
    %6 = tpu.matmul %4, %5, %cst {dimension_numbers = #tpu.dot_dimension_numbers<[1], [0], [0], [1], [0, 0, 1, 1], [], []>} : vector<16x32xbf16>, vector<32x64xbf16>, vector<16x64xf32> -> vector<16x64xf32>
    %cst_5 = arith.constant 2.500000e-01 : f32
    %7 = vector.broadcast %cst_5 : f32 to vector<16x64xf32>
    %8 = arith.mulf %6, %7 : vector<16x64xf32>
    %9 = arith.truncf %8 : vector<16x64xf32> to vector<16x64xbf16>
    %c0_6 = arith.constant 0 : index
    %c0_7 = arith.constant 0 : index
    %10 = vector.load %arg10[%c0_6, %c0_7] : memref<16x64xbf16, #tpu.memory_space<vmem>>, vector<16x64xbf16>
    tpu.vector_store %arg10[%c0_6, %c0_7], %9 {strides = array<i32>} : memref<16x64xbf16, #tpu.memory_space<vmem>>, vector<16x64xbf16>,
    %c0_8 = arith.constant 0 : index
    %c0_9 = arith.constant 0 : index
    %11 = vector.load %arg10[%c0_8, %c0_9] : memref<16x64xbf16, #tpu.memory_space<vmem>>, vector<16x16xbf16>
    %c0_10 = arith.constant 0 : index
    %c0_11 = arith.constant 0 : index
    %12 = vector.load %arg11[%c0_10, %c0_11] : memref<8x64xbf16, #tpu.memory_space<vmem>>, vector<8x16xbf16>
    %c0_12 = arith.constant 0 : index
    %c0_13 = arith.constant 0 : index
    %13 = vector.load %arg12[%c0_12, %c0_13] : memref<8x64xbf16, #tpu.memory_space<vmem>>, vector<8x16xbf16>
    %cst_14 = arith.constant dense<0.000000e+00> : vector<16x8xf32>
    %14 = tpu.matmul %11, %12, %cst_14 {dimension_numbers = #tpu.dot_dimension_numbers<[1], [1], [0], [0], [0, 0, 1, 0], [], []>} : vector<16x16xbf16>, vector<8x16xbf16>, vector<16x8xf32> -> vector<16x8xf32>
    %cst_15 = arith.constant dense<0xFF800000> : vector<16xf32>
    %15 = vector.multi_reduction <maximumf>, %14, %cst_15 [1] : vector<16x8xf32> to vector<16xf32>
    %16 = vector.shape_cast %15 : vector<16xf32> to vector<16x1xf32>
    %17 = vector.broadcast %16 : vector<16x1xf32> to vector<16x8xf32>
    %18 = arith.subf %14, %17 : vector<16x8xf32>
    %19 = math.exp %18 : vector<16x8xf32>
    %cst_16 = arith.constant dense<0.000000e+00> : vector<16xf32>
    %20 = vector.multi_reduction <add>, %19, %cst_16 [1] : vector<16x8xf32> to vector<16xf32>
    %21 = vector.shape_cast %20 : vector<16xf32> to vector<16x1xf32>
    %22 = arith.truncf %19 : vector<16x8xf32> to vector<16x8xbf16>
    %cst_17 = arith.constant dense<0.000000e+00> : vector<16x16xf32>
    %23 = tpu.matmul %22, %13, %cst_17 {dimension_numbers = #tpu.dot_dimension_numbers<[1], [0], [0], [1], [0, 0, 1, 1], [], []>} : vector<16x8xbf16>, vector<8x16xbf16>, vector<16x16xf32> -> vector<16x16xf32>
    %24 = tpu.reciprocal %21 {approx = true} : vector<16x1xf32> -> vector<16x1xf32>
    %25 = vector.broadcast %24 : vector<16x1xf32> to vector<16x16xf32>
    %26 = arith.mulf %23, %25 : vector<16x16xf32>
    %27 = arith.truncf %26 : vector<16x16xf32> to vector<16x16xbf16>
    %c0_18 = arith.constant 0 : index
    %c0_19 = arith.constant 0 : index
    %28 = vector.load %arg13[%c0_18, %c0_19] : memref<16x64xbf16, #tpu.memory_space<vmem>>, vector<16x16xbf16>
    tpu.vector_store %arg13[%c0_18, %c0_19], %27 {strides = array<i32>} : memref<16x64xbf16, #tpu.memory_space<vmem>>, vector<16x16xbf16>,
    %c0_20 = arith.constant 0 : index
    %c16 = arith.constant 16 : index
    %29 = vector.load %arg10[%c0_20, %c16] : memref<16x64xbf16, #tpu.memory_space<vmem>>, vector<16x16xbf16>
    %c0_21 = arith.constant 0 : index
    %c16_22 = arith.constant 16 : index
    %30 = vector.load %arg11[%c0_21, %c16_22] : memref<8x64xbf16, #tpu.memory_space<vmem>>, vector<8x16xbf16>
    %c0_23 = arith.constant 0 : index
    %c16_24 = arith.constant 16 : index
    %31 = vector.load %arg12[%c0_23, %c16_24] : memref<8x64xbf16, #tpu.memory_space<vmem>>, vector<8x16xbf16>
    %cst_25 = arith.constant dense<0.000000e+00> : vector<16x8xf32>
    %32 = tpu.matmul %29, %30, %cst_25 {dimension_numbers = #tpu.dot_dimension_numbers<[1], [1], [0], [0], [0, 0, 1, 0], [], []>} : vector<16x16xbf16>, vector<8x16xbf16>, vector<16x8xf32> -> vector<16x8xf32>
    %cst_26 = arith.constant dense<0xFF800000> : vector<16xf32>
    %33 = vector.multi_reduction <maximumf>, %32, %cst_26 [1] : vector<16x8xf32> to vector<16xf32>
    %34 = vector.shape_cast %33 : vector<16xf32> to vector<16x1xf32>
    %35 = vector.broadcast %34 : vector<16x1xf32> to vector<16x8xf32>
    %36 = arith.subf %32, %35 : vector<16x8xf32>
    %37 = math.exp %36 : vector<16x8xf32>
    %cst_27 = arith.constant dense<0.000000e+00> : vector<16xf32>
    %38 = vector.multi_reduction <add>, %37, %cst_27 [1] : vector<16x8xf32> to vector<16xf32>
    %39 = vector.shape_cast %38 : vector<16xf32> to vector<16x1xf32>
    %40 = arith.truncf %37 : vector<16x8xf32> to vector<16x8xbf16>
    %cst_28 = arith.constant dense<0.000000e+00> : vector<16x16xf32>
    %41 = tpu.matmul %40, %31, %cst_28 {dimension_numbers = #tpu.dot_dimension_numbers<[1], [0], [0], [1], [0, 0, 1, 1], [], []>} : vector<16x8xbf16>, vector<8x16xbf16>, vector<16x16xf32> -> vector<16x16xf32>
    %42 = tpu.reciprocal %39 {approx = true} : vector<16x1xf32> -> vector<16x1xf32>
    %43 = vector.broadcast %42 : vector<16x1xf32> to vector<16x16xf32>
    %44 = arith.mulf %41, %43 : vector<16x16xf32>
    %45 = arith.truncf %44 : vector<16x16xf32> to vector<16x16xbf16>
    %c0_29 = arith.constant 0 : index
    %c16_30 = arith.constant 16 : index
    %46 = vector.load %arg13[%c0_29, %c16_30] : memref<16x64xbf16, #tpu.memory_space<vmem>>, vector<16x16xbf16>
    tpu.vector_store %arg13[%c0_29, %c16_30], %45 {strides = array<i32>} : memref<16x64xbf16, #tpu.memory_space<vmem>>, vector<16x16xbf16>,
    %c0_31 = arith.constant 0 : index
    %c32 = arith.constant 32 : index
    %47 = vector.load %arg10[%c0_31, %c32] : memref<16x64xbf16, #tpu.memory_space<vmem>>, vector<16x16xbf16>
    %c0_32 = arith.constant 0 : index
    %c32_33 = arith.constant 32 : index
    %48 = vector.load %arg11[%c0_32, %c32_33] : memref<8x64xbf16, #tpu.memory_space<vmem>>, vector<8x16xbf16>
    %c0_34 = arith.constant 0 : index
    %c32_35 = arith.constant 32 : index
    %49 = vector.load %arg12[%c0_34, %c32_35] : memref<8x64xbf16, #tpu.memory_space<vmem>>, vector<8x16xbf16>
    %cst_36 = arith.constant dense<0.000000e+00> : vector<16x8xf32>
    %50 = tpu.matmul %47, %48, %cst_36 {dimension_numbers = #tpu.dot_dimension_numbers<[1], [1], [0], [0], [0, 0, 1, 0], [], []>} : vector<16x16xbf16>, vector<8x16xbf16>, vector<16x8xf32> -> vector<16x8xf32>
    %cst_37 = arith.constant dense<0xFF800000> : vector<16xf32>
    %51 = vector.multi_reduction <maximumf>, %50, %cst_37 [1] : vector<16x8xf32> to vector<16xf32>
    %52 = vector.shape_cast %51 : vector<16xf32> to vector<16x1xf32>
    %53 = vector.broadcast %52 : vector<16x1xf32> to vector<16x8xf32>
    %54 = arith.subf %50, %53 : vector<16x8xf32>
    %55 = math.exp %54 : vector<16x8xf32>
    %cst_38 = arith.constant dense<0.000000e+00> : vector<16xf32>
    %56 = vector.multi_reduction <add>, %55, %cst_38 [1] : vector<16x8xf32> to vector<16xf32>
    %57 = vector.shape_cast %56 : vector<16xf32> to vector<16x1xf32>
    %58 = arith.truncf %55 : vector<16x8xf32> to vector<16x8xbf16>
    %cst_39 = arith.constant dense<0.000000e+00> : vector<16x16xf32>
    %59 = tpu.matmul %58, %49, %cst_39 {dimension_numbers = #tpu.dot_dimension_numbers<[1], [0], [0], [1], [0, 0, 1, 1], [], []>} : vector<16x8xbf16>, vector<8x16xbf16>, vector<16x16xf32> -> vector<16x16xf32>
    %60 = tpu.reciprocal %57 {approx = true} : vector<16x1xf32> -> vector<16x1xf32>
    %61 = vector.broadcast %60 : vector<16x1xf32> to vector<16x16xf32>
    %62 = arith.mulf %59, %61 : vector<16x16xf32>
    %63 = arith.truncf %62 : vector<16x16xf32> to vector<16x16xbf16>
    %c0_40 = arith.constant 0 : index
    %c32_41 = arith.constant 32 : index
    %64 = vector.load %arg13[%c0_40, %c32_41] : memref<16x64xbf16, #tpu.memory_space<vmem>>, vector<16x16xbf16>
    tpu.vector_store %arg13[%c0_40, %c32_41], %63 {strides = array<i32>} : memref<16x64xbf16, #tpu.memory_space<vmem>>, vector<16x16xbf16>,
    %c0_42 = arith.constant 0 : index
    %c48 = arith.constant 48 : index
    %65 = vector.load %arg10[%c0_42, %c48] : memref<16x64xbf16, #tpu.memory_space<vmem>>, vector<16x16xbf16>
    %c0_43 = arith.constant 0 : index
    %c48_44 = arith.constant 48 : index
    %66 = vector.load %arg11[%c0_43, %c48_44] : memref<8x64xbf16, #tpu.memory_space<vmem>>, vector<8x16xbf16>
    %c0_45 = arith.constant 0 : index
    %c48_46 = arith.constant 48 : index
    %67 = vector.load %arg12[%c0_45, %c48_46] : memref<8x64xbf16, #tpu.memory_space<vmem>>, vector<8x16xbf16>
    %cst_47 = arith.constant dense<0.000000e+00> : vector<16x8xf32>
    %68 = tpu.matmul %65, %66, %cst_47 {dimension_numbers = #tpu.dot_dimension_numbers<[1], [1], [0], [0], [0, 0, 1, 0], [], []>} : vector<16x16xbf16>, vector<8x16xbf16>, vector<16x8xf32> -> vector<16x8xf32>
    %cst_48 = arith.constant dense<0xFF800000> : vector<16xf32>
    %69 = vector.multi_reduction <maximumf>, %68, %cst_48 [1] : vector<16x8xf32> to vector<16xf32>
    %70 = vector.shape_cast %69 : vector<16xf32> to vector<16x1xf32>
    %71 = vector.broadcast %70 : vector<16x1xf32> to vector<16x8xf32>
    %72 = arith.subf %68, %71 : vector<16x8xf32>
    %73 = math.exp %72 : vector<16x8xf32>
    %cst_49 = arith.constant dense<0.000000e+00> : vector<16xf32>
    %74 = vector.multi_reduction <add>, %73, %cst_49 [1] : vector<16x8xf32> to vector<16xf32>
    %75 = vector.shape_cast %74 : vector<16xf32> to vector<16x1xf32>
    %76 = arith.truncf %73 : vector<16x8xf32> to vector<16x8xbf16>
    %cst_50 = arith.constant dense<0.000000e+00> : vector<16x16xf32>
    %77 = tpu.matmul %76, %67, %cst_50 {dimension_numbers = #tpu.dot_dimension_numbers<[1], [0], [0], [1], [0, 0, 1, 1], [], []>} : vector<16x8xbf16>, vector<8x16xbf16>, vector<16x16xf32> -> vector<16x16xf32>
    %78 = tpu.reciprocal %75 {approx = true} : vector<16x1xf32> -> vector<16x1xf32>
    %79 = vector.broadcast %78 : vector<16x1xf32> to vector<16x16xf32>
    %80 = arith.mulf %77, %79 : vector<16x16xf32>
    %81 = arith.truncf %80 : vector<16x16xf32> to vector<16x16xbf16>
    %c0_51 = arith.constant 0 : index
    %c48_52 = arith.constant 48 : index
    %82 = vector.load %arg13[%c0_51, %c48_52] : memref<16x64xbf16, #tpu.memory_space<vmem>>, vector<16x16xbf16>
    tpu.vector_store %arg13[%c0_51, %c48_52], %81 {strides = array<i32>} : memref<16x64xbf16, #tpu.memory_space<vmem>>, vector<16x16xbf16>,
    %c0_53 = arith.constant 0 : index
    %c0_54 = arith.constant 0 : index
    %83 = vector.load %arg13[%c0_53, %c0_54] : memref<16x64xbf16, #tpu.memory_space<vmem>>, vector<16x64xbf16>
    %c0_55 = arith.constant 0 : index
    %c0_56 = arith.constant 0 : index
    %84 = vector.load %arg7[%c0_55, %c0_56] : memref<64x32xbf16, #tpu.memory_space<vmem>>, vector<64x32xbf16>
    %cst_57 = arith.constant dense<0.000000e+00> : vector<16x32xf32>
    %85 = tpu.matmul %83, %84, %cst_57 {dimension_numbers = #tpu.dot_dimension_numbers<[1], [0], [0], [1], [0, 0, 1, 1], [], []>} : vector<16x64xbf16>, vector<64x32xbf16>, vector<16x32xf32> -> vector<16x32xf32>
    %c0_58 = arith.constant 0 : index
    %c0_59 = arith.constant 0 : index
    %86 = vector.load %arg8[%c0_58, %c0_59] : memref<1x32xf32, #tpu.memory_space<vmem>>, vector<1x32xf32>
    %87 = vector.broadcast %86 : vector<1x32xf32> to vector<16x32xf32>
    %88 = arith.addf %85, %87 : vector<16x32xf32>
    %c0_60 = arith.constant 0 : index
    %c0_61 = arith.constant 0 : index
    %c0_62 = arith.constant 0 : index
    %89 = vector.load %arg9[%c0_60, %c0_61, %c0_62] : memref<1x16x32xf32, #tpu.memory_space<vmem>>, vector<1x16x32xf32>
    %90 = vector.shape_cast %89 : vector<1x16x32xf32> to vector<16x32xf32>
    %91 = vector.shape_cast %88 : vector<16x32xf32> to vector<1x16x32xf32>
    tpu.vector_store %arg9[%c0_60, %c0_61, %c0_62], %91 {strides = array<i32>} : memref<1x16x32xf32, #tpu.memory_space<vmem>>, vector<1x16x32xf32>,
    return
  }
  func.func @transform_0(%arg0: i32, %arg1: i32) -> (i32, i32, i32) {
    %c0_i32 = arith.constant 0 : i32
    %c0_i32_0 = arith.constant 0 : i32
    return %arg0, %arg1, %c0_i32 : i32, i32, i32
  }
  func.func @transform_1(%arg0: i32, %arg1: i32) -> (i32, i32, i32) {
    %c0_i32 = arith.constant 0 : i32
    %c0_i32_0 = arith.constant 0 : i32
    %c0_i32_1 = arith.constant 0 : i32
    return %arg0, %c0_i32, %c0_i32_0 : i32, i32, i32
  }
  func.func @transform_2(%arg0: i32, %arg1: i32) -> (i32, i32) {
    %c0_i32 = arith.constant 0 : i32
    %c0_i32_0 = arith.constant 0 : i32
    %c0_i32_1 = arith.constant 0 : i32
    return %c0_i32, %c0_i32_0 : i32, i32
  }
  func.func @transform_3(%arg0: i32, %arg1: i32) -> (i32, i32) {
    %c0_i32 = arith.constant 0 : i32
    %c0_i32_0 = arith.constant 0 : i32
    %c0_i32_1 = arith.constant 0 : i32
    return %c0_i32, %c0_i32_0 : i32, i32
  }
  func.func @transform_4(%arg0: i32, %arg1: i32) -> (i32, i32) {
    %c0_i32 = arith.constant 0 : i32
    %c0_i32_0 = arith.constant 0 : i32
    %c0_i32_1 = arith.constant 0 : i32
    return %c0_i32, %c0_i32_0 : i32, i32
  }
  func.func @transform_5(%arg0: i32, %arg1: i32) -> (i32, i32) {
    %c0_i32 = arith.constant 0 : i32
    %c0_i32_0 = arith.constant 0 : i32
    %c0_i32_1 = arith.constant 0 : i32
    return %c0_i32, %c0_i32_0 : i32, i32
  }
  func.func @transform_6(%arg0: i32, %arg1: i32) -> (i32, i32) {
    %c0_i32 = arith.constant 0 : i32
    %c0_i32_0 = arith.constant 0 : i32
    %c0_i32_1 = arith.constant 0 : i32
    return %c0_i32, %c0_i32_0 : i32, i32
  }
  func.func @transform_7(%arg0: i32, %arg1: i32) -> (i32, i32, i32) {
    %c0_i32 = arith.constant 0 : i32
    %c0_i32_0 = arith.constant 0 : i32
    return %arg0, %arg1, %c0_i32 : i32, i32, i32
  }
}

</mosaic_0001>

<bundles_post_ra>
// kernel: tpu_custom_call.1
= control target key start
LH: loop header
LB: loop body
LE: loop exit
PB: predicated region body
PF: predicated region fallthrough
CT: control target
= control target key end

     0   :  { %s1703_s0 = inlined_call_operand.vmem [shape: bf16[2,16,32], index: 0, kind: input, shape index: {}]   ;;  %s1704_s1 = inlined_call_operand.hbm [shape: bf16[2,8,24], index: 1, kind: input, shape index: {}]   ;;  %s1705_s2 = inlined_call_operand.vmem [shape: bf16[32,64], index: 2, kind: input, shape index: {}]   ;;  %s1706_s3 = inlined_call_operand.vmem [shape: bf16[24,64], index: 3, kind: input, shape index: {}]   ;;  %s1707_s4 = inlined_call_operand.hbm [shape: bf16[24,64], index: 4, kind: input, shape index: {}]   ;;  %s1708_s5 = inlined_call_operand.vmem [shape: bf16[64,32], index: 5, kind: input, shape index: {}]   ;;  %s1709_s6 = inlined_call_operand.vmem [shape: f32[1,32], index: 6, kind: input, shape index: {}]   ;;  %s1710_s7 = inlined_call_operand.hbm [shape: f32[2,16,32], index: 7, kind: output, shape index: {}]  }
   0x1   :  { %1712 = sst [smem:[#allocation16_spill]] %s1707_s4 }
   0x2   :  { %12 = vsyncpa [#allocation7], 0 }
   0x3   :  { %14 = vsyncpa [#allocation7 + $0x1], 0 }
   0x4   :  { %15 = vsyncpa [#allocation10], 0 }
   0x5   :  { %16 = vsyncpa [#allocation8], 0 }
   0x6   :  { %18 = vsyncpa [#allocation8 + $0x1], 0  ;;  %s1465_s24 = smov 0   ;;  %s1467_s25 = smov 0  }
   0x7   :  { %s1469_s26 = smov 0   ;;  %s1471_s27 = smov 0  }
   0x8   :  { %s1473_s28 = smov 0   ;;  %s1475_s29 = smov 0  }
   0x9 LB: > { %s1048_s30 = sadd.s32 4294967295, %s1412_s29   ;;  %p1050_p0 = scmp.ge.s32.totalorder %s1412_s29, 1  ;;  %s1412_s29 = sphi %s1475_s29, %s24_s29   ;;  %s1408_s28 = sphi %s1473_s28, %s1726_s28   ;;  %s1404_s27 = sphi %s1471_s27, %s1725_s27   ;;  %s1400_s26 = sphi %s1469_s26, %s1724_s26   ;;  %s1396_s25 = sphi %s1467_s25, %s1723_s25   ;;  %s1392_s24 = sphi %s1465_s24, %s1722_s24  }
   0xa   : > { %p1497_p1 = scmp.eq.s32.totalorder %s1048_s30, 0  ;;  %p228_p2 = scmp.lt.s32.totalorder %s1412_s29, 3 }
   0xb   : > { %s1714_s4 = sld [smem:[#allocation16_spill]]  ;;  %s1414_s13 = smov [#allocation9]  }
   0xc   : > { %p1505_p3 = pnand %p1050_p0, %p228_p2  ;;  %s247_s14 = sshll.u32 %s1414_s13, 4  ;;  %s248_s14 = int_to_ptr.vmem [resolvable:$true] %s247_s14 }
   0xd   : > { %p1052_p6 = scmp.ge.s32.totalorder %s1412_s29, 2  ;;  %s1415_s15 = smov 64  }
   0xe   : > { %p1158_p4 = pneg %p1505_p3  ;;  %s1416_s16 = smov 4  }
   0xf   : > { %s1049_s17 = sadd.s32 4294967294, %s1412_s29   ;;  %s36_s18 = sadd.s32 1, %s1408_s28 }
  0x10   : > { %p1159_p5 = pnand %p1158_p4, %p1497_p1  ;;  %s71_s19 = sadd.s32 1, %s1400_s26 }
  0x11   : > { %s245_s11 = sshll.u32 %s1714_s4, 4  ;;  %p38_p7 = scmp.ge.s32.totalorder %s36_s18, 2  ;;  %s246_s11 = int_to_ptr.hbm [resolvable:$true] %s245_s11 }
  0x12   : > { %1161 = dma.hbm_to_vmem [thread:$0]  (!%p1159_p5), %s246_s11, 192, %s248_s14, [#allocation10], %s1415_s15, %s1415_s15, %s1416_s16  }
  0x13   : > { %p78_p8 = scmp.ne.s32.totalorder %s1400_s26, %s1396_s25  ;;  %p79_p9 = scmp.eq.s32.totalorder %s1412_s29, 0 }
  0x14   : > { %p84_p10 = scmp.ne.s32.totalorder %s1396_s25, %s1392_s24  ;;  %s1728_s18 = smov (%p38_p7, %s36_s18), 0 }
  0x15   : > { %1716 = sst [smem:[#allocation15_spill]] %s1728_s18  ;;  %p1524_p11 = por %p79_p9, %p78_p8 }
  0x16   : > { %p1530_p12 = por %p1497_p1, %p84_p10  ;;  %s68_s22 = ssub.s32 %s1408_s28, %s1728_s18 }
  0x17   : > { %p215_p13 = scmp.eq.s32.totalorder %s1048_s30, 1  ;;  %p69_p0 = scmp.eq.s32.totalorder %s68_s22, 0 }
  0x18   : > { %p221_p2 = scmp.eq.s32.totalorder %s1049_s17, 1  ;;  %p1171_p5 = scmp.lt.s32.totalorder %s1412_s29, 2 }
  0x19   : > { %p1536_p4 = por %p215_p13, %p78_p8  ;;  %s280_s11 = sand.u32 1, %s1400_s26  }
  0x1a   : > { %s1542_s9 = scalar_select %p69_p0, %s1400_s26, %s71_s19  }
  0x1b   : > { %p1544_p7 = por %p221_p2, %p84_p10  ;;  %s1053_s13 = sshll.u32 %s280_s11, 2 }
  0x1c   : > { %s1054_s14 = sshll.u32 %s1408_s28, 2  ;;  %s284_s22 = scalar_lea.vmem [#allocation6], %s1053_s13 }
  0x1d   : > { %s288_s30 = scalar_lea.hbm %s1704_s1, %s1054_s14  ;;  %s292_s17 = sshll.u32 %s284_s22, 4  ;;  %s293_s17 = int_to_ptr.vmem [resolvable:$true] %s292_s17 }
  0x1e   : > { %s290_s4 = sshll.u32 %s288_s30, 4  ;;  %p1163_p8 = pnand %p1171_p5, %p1524_p11  ;;  %s291_s4 = int_to_ptr.hbm [resolvable:$true] %s290_s4 }
  0x1f   : > { %s281_s19 = scalar_lea.sflag [#allocation7], %s280_s11  ;;  %301 = sbr.rel (%p1505_p3) target bundleno = 1023 (0x3ff), region = 48 }
  0x20   : > { %1165 = dma.hbm_to_vmem [thread:$0]  (!%p1163_p8), %s291_s4, 64, %s293_s17, %s281_s19  }
  0x21   : > { %s1558_s18 = sand.u32 (!%p1505_p3), 1, %s1396_s25  }
  0x22   : > { %s1056_s15 = sshll.u32 (!%p1505_p3), %s1558_s18, 2  ;;  %s304_s14 = scalar_lea.sflag (!%p1505_p3), [#allocation7], %s1558_s18 }
  0x23   : > { %s307_s13 = scalar_lea.vmem (!%p1505_p3), [#allocation6], %s1056_s15 }
  0x24   : > { %1379 = dma.done.wait (%p1530_p12), %s304_s14, 64  }
  0x25   : > { %1381 = vsyncadd (%p1530_p12), %s304_s14, 4294967232 }
  0x26   : > { %1383 = dma.done.wait (%p1497_p1), [#allocation10], 192  }
  0x27   : > { %1385 = vsyncadd (%p1497_p1), [#allocation10], 4294967104  ;;  %p354_p3 = scmp.lt.s32.totalorder %s1404_s27, 1  ;;  %v1139_v0 = vld [vmem:[%s1705_s2 + $0x8] sm:$0xff]  ;;  %vm386_vm0 = vcmask 1043456   ;;  %v1138_v3 = vld [vmem:[%s1705_s2] sm:$0xff] }
  0x28   : > { %v372_v1 = vld [vmem:[%s1706_s3 + $0x8] sm:$0xf]  ;;  %469 = vmatpush.bf16.msra.mxu2 %v1139_v0  ;;  %v1135_v7 = vld [vmem:[%s1706_s3] sm:$0xff]  ;;  %vm459_vm1 = vcmask 261120   ;;  %v369_v8 = vld [vmem:[%s307_s13] sm:$0xf] }
  0x29   : > { %s355_s4 = scalar_select %p354_p3, %s1404_s27, 1  ;;  %v378_v2 = vunpack.c.l.b16 %v372_v1  ;;  %vm382_vm2 = vcmask 195584   ;;  %vm404_vm3 = vcmask 519168   ;;  %v408_v10 = vld [vmem:[#allocation9 + $0x8] sm:$0xf]  ;;  %v1136_v18 = vld [vmem:[#allocation9] sm:$0xff] }
  0x2a   : > { %v414_v12 = vunpack.c.l.b16 %v408_v10  ;;  %vm493_vm4 = vcmask 130048   ;;  %s1417_s13 = smov 96   ;;  %vm514_vm5 = vcmask 64512   ;;  %s1420_s20 = smov 16   ;;  %vm561_vm6 = vcmask 125952  }
  0x2b   : > { %s1134_s12 = sshll.u32 %s355_s4, 3  ;;  %v380_v4 = vpack.c.b16 %v378_v2, %v378_v2  ;;  %s1418_s4 = smov 112   ;;  %vm658_vm7 = vcmask 257152   ;;  %vm755_vm8 = vcmask 388352   ;;  %vm852_vm9 = vcmask 519552  }
  0x2c   : > { %s361_s19 = scalar_lea.vmem %s1703_s0, %s1134_s12  ;;  %470 = vmatpush.bf16.msra.mxu2 %v1138_v3  ;;  %v416_v15 = vpack.c.b16 %v414_v12, %v414_v12  ;;  %s1419_s12 = smov 80   ;;  %vm898_vm10 = vcmask 523264  }
  0x2d   : > { %v388_v5 = vsel %vm386_vm0, %v380_v4, 0  ;;  %v1137_v6 = vld [vmem:[%s361_s19] sm:$0xff]  ;;  %s1421_s11 = smov 32   ;;  %s1422_s16 = smov 48  }
  0x2e   : > { %396 = vmatpush.bf16.msra.mxu0 %v388_v5  ;;  %v419_v17 = vsel %vm386_vm0, %v416_v15, 0  ;;  %s919_s17 = scalar_lea.sflag [#allocation8], %s1558_s18 }
  0x2f   : > { %1083 = vmatmul.msk.bf16.vlgmr.msra.gmra.mxu2 %vm459_vm1, %v1137_v6  ;;  %427 = vmatpush.bf16.msra.mxu1 %v419_v17 }
  0x32   : > { %397 = vmatpush.bf16.msra.mxu0 %v1135_v7 }
  0x33   : > { %428 = vmatpush.bf16.msra.mxu1 %v1136_v18 }
  0x35   : > { %1065 = vmatmul.msk.bf16.vlgmr.msra.gmra.mxu0 %vm382_vm2, %v369_v8 }
  0x36   : > { %1070 = vmatmul.msk.bf16.vlgmr.msra.gmra.mxu1 %vm382_vm2, %v369_v8 }
  0xb2   : > { %v399_v9 = vpop.f32.mrf.mxu0  ;;  %v472_v13 = vpop.f32.mrf.mxu2 }
  0xb3   : > { %v403_v11 = vpack.c.bf16 %v399_v9, %v399_v9  ;;  %v477_v14 = vmul.f32 0.25, %v472_v13  ;;  %v430_v46 = vpop.f32.mrf.mxu1 }
  0xb4   : > { %v434_v47 = vpack.c.bf16 %v430_v46, %v430_v46 }
  0xb5   : > { %405 = vst.msk [vmem:[#allocation3] sm:$0xf] %vm404_vm3, %v403_v11  ;;  %v479_v16 = vpack.c.bf16 %v477_v14, %v477_v14 }
  0xb6   : > { %435 = vst.msk [vmem:[#allocation4] sm:$0xf] %vm404_vm3, %v434_v47 }
  0xb7   : > { %482 = vst.msk [vmem:[#allocation2] sm:$0xf] %vm404_vm3, %v479_v16 }
  0xba   : > { %v401_v19 = vpop.f32.mrf.mxu0  ;;  %v474_v20 = vpop.f32.mrf.mxu2 }
  0xbb   : > { %v478_v24 = vmul.f32 0.25, %v474_v20  ;;  %v432_v48 = vpop.f32.mrf.mxu1 }
  0xbc   : > { %v486_v21 = vld [vmem:[#allocation3] sm:$0xf] }
  0xbd   : > { %v663_v22 = vld [vmem:[#allocation3] sm:$0xf]  ;;  %v498_v25 = vsel %vm493_vm4, %v486_v21, 0  ;;  %v480_v28 = vpack.c.bf16 %v478_v24, %v478_v24  ;;  %v567_v49 = vld [vmem:[#allocation4] sm:$0xf] }
  0xbe   : > { %v566_v23 = vld [vmem:[#allocation3] sm:$0xf]  ;;  %v673_v26 = vunpack.c.l.b16 %v663_v22  ;;  %507 = vmatpush.bf16.xpose.msra.mxu3 %v498_v25  ;;  %v487_v50 = vld [vmem:[#allocation4] sm:$0xf]  ;;  %v620_v51 = vunpack.c.l.b16 %v567_v49 }
  0xbf   : > { %v576_v27 = vunpack.c.l.b16 %v566_v23  ;;  %v760_v31 = vld [vmem:[#allocation3] sm:$0xf]  ;;  %483 = vst.msk [vmem:[#allocation2 + $0x4] sm:$0xf] %vm404_vm3, %v480_v28  ;;  %v539_v52 = vsel %vm386_vm0, %v487_v50, 0 }
  0xc0   : > { %v674_v29 = vpack.c.b16 %v673_v26, %v673_v26  ;;  %v770_v32 = vunpack.c.l.b16 %v760_v31  ;;  %548 = vmatpush.bf16.msrb.mxu0 %v539_v52  ;;  %v621_v53 = vpack.c.b16 %v620_v51, %v620_v51  ;;  %v664_v3 = vld [vmem:[#allocation4] sm:$0xf] }
  0xc1   : > { %v577_v30 = vpack.c.b16 %v576_v27, %v576_v27  ;;  %v717_v8 = vunpack.c.l.b16 %v664_v3  ;;  %v761_v21 = vld [vmem:[#allocation4] sm:$0xf] }
  0xc2   : > { %675 = vrot.lane.b32.xlu1 %v674_v29, %s1417_s13  ;;  %v771_v33 = vpack.c.b16 %v770_v32, %v770_v32  ;;  %v814_v22 = vunpack.c.l.b16 %v761_v21 }
  0xc3   : > { %578 = vrot.lane.b32.xlu0 %v577_v30, %s1418_s4  ;;  %v718_v12 = vpack.c.b16 %v717_v8, %v717_v8 }
  0xc4   : > { %v815_v23 = vpack.c.b16 %v814_v22, %v814_v22 }
  0xc6   : > { %v1142_v34 = vld [vmem:[#allocation2] sm:$0xff] }
  0xc7   : > { %v1141_v35 = vld [vmem:[#allocation2] sm:$0xff]  ;;  %670 = vrot.lane.b32.xlu2 %v1142_v34, %s1417_s13 }
  0xc8   : > { %v1140_v36 = vld [vmem:[#allocation2] sm:$0xff] }
  0xc9   : > { %1088 = vmatmul.msk.bf16.vlgmr.msra.gmra.mxu3 %vm493_vm4, %v1140_v36  ;;  %v1143_v37 = vld [vmem:[#allocation2] sm:$0xff] }
  0xca   : > { %772 = vrot.lane.b32.xlu1 %v771_v33, %s1419_s12 }
  0xcb   : > { %573 = vrot.lane.b32.xlu0 %v1141_v35, %s1418_s4 }
  0xcf   : > { %767 = vrot.lane.b32.xlu2 %v1143_v37, %s1419_s12 }
  0xd3   : > { %622 = vrot.lane.b32.xlu0 %v621_v53, %s1418_s4 }
 0x121   : > { %v671_v42 = vpop.permute.xlu2 %670 }
 0x129   : > { %v768_v54 = vpop.permute.xlu2 %767 }
 0x134   : > { %v676_v38 = vpop.permute.xlu1 %675 }
 0x135   : > { %v579_v39 = vpop.permute.xlu0 %578  ;;  %v681_v41 = vsel %vm493_vm4, %v676_v38, 0 }
 0x136   : > { %v584_v40 = vsel %vm493_vm4, %v579_v39, 0  ;;  %690 = vmatpush.bf16.xpose.msrb.mxu3 %v681_v41 }
 0x137   : > { %593 = vmatpush.bf16.xpose.msrb.mxu1 %v584_v40 }
 0x13c   : > { %v773_v43 = vpop.permute.xlu1 %772 }
 0x13d   : > { %v778_v44 = vsel %vm493_vm4, %v773_v43, 0  ;;  %1100 = vmatmul.msk.bf16.vlgmr.msrb.gmra.mxu3 %vm493_vm4, %v671_v42  ;;  %v574_v45 = vpop.permute.xlu0 %573 }
 0x13e   : > { %1094 = vmatmul.msk.bf16.vlgmr.msrb.gmra.mxu1 %vm493_vm4, %v574_v45 }
 0x13f   : > { %787 = vmatpush.bf16.xpose.msra.mxu1 %v778_v44 }
 0x145   : > { %v623_v4 = vpop.permute.xlu0 %622 }
 0x146   : > { %v628_v9 = vsel %vm386_vm0, %v623_v4, 0 }
 0x147   : > { %637 = vmatpush.bf16.msrb.mxu2 %v628_v9 }
 0x14c   : > { %v509_v55 = vpop.f32.mrf.mxu3 }
 0x14d   : > { %v515_v56 = vsel %vm514_vm5, %v509_v55, -inf }
 0x14e   : > { %1106 = vmatmul.msk.bf16.vlgmr.msra.gmra.mxu1 %vm493_vm4, %v768_v54  ;;  %516 = vmax.xlane.f32.xlu2 %v515_v56 }
 0x154   : > { %v511_v57 = vpop.f32.mrf.mxu3 }
 0x155   : > { %v518_v58 = vsel %vm514_vm5, %v511_v57, -inf }
 0x156   : > { %519 = vmax.xlane.f32.xlu2 %v518_v58 }
 0x1bb   : > { %v595_v59 = vpop.f32.mrf.mxu1 }
 0x1bc   : > { %v600_v60 = vsel %vm514_vm5, %v595_v59, -inf }
 0x1bd   : > { %601 = vmax.xlane.f32.xlu0 %v600_v60 }
 0x1c0   : > { %v692_v61 = vpop.f32.mrf.mxu3 }
 0x1c1   : > { %v697_v62 = vsel %vm514_vm5, %v692_v61, -inf  ;;  %v517_v0 = vpop.xlane.xlu2 %516 }
 0x1c2   : > { %698 = vmax.xlane.f32.xlu1 %v697_v62  ;;  %v521_v1 = vsub.f32 %v509_v55, %v517_v0 }
 0x1c3   : > { %v597_v63 = vpop.f32.mrf.mxu1 }
 0x1c4   : > { %v603_v2 = vsel %vm514_vm5, %v597_v63, -inf  ;;  %v523_v5 = vmul.f32 1.442695, %v521_v1 }
 0x1c6   : > { %1234 = vpow2.f32 %v523_v5 }
 0x1c8   : > { %v694_v19 = vpop.f32.mrf.mxu3 }
 0x1c9   : > { %v520_v7 = vpop.xlane.xlu2 %519  ;;  %v700_v20 = vsel %vm514_vm5, %v694_v19, -inf }
 0x1ca   : > { %604 = vmax.xlane.f32.xlu1 %v603_v2  ;;  %v522_v10 = vsub.f32 %v511_v57, %v520_v7 }
 0x1cb   : > { %v789_v6 = vpop.f32.mrf.mxu1 }
 0x1cc   : > { %v525_v11 = vmul.f32 1.442695, %v522_v10  ;;  %v794_v13 = vsel %vm514_vm5, %v789_v6, -inf  ;;  %v1621_v16 = vpop.eup %1234 }
 0x1cd   : > { %v527_v60 = vsel %vm514_vm5, %v1621_v16, 0.0 }
 0x1ce   : > { %1236 = vpow2.f32 %v525_v11 }
 0x1d1   : > { %719 = vrot.lane.b32.xlu0 %v718_v12, %s1417_s13  ;;  %s1058_s13 = sshll.u32 %s1558_s18, 4 }
 0x1d2   : > { %795 = vmax.xlane.f32.xlu1 %v794_v13  ;;  %s352_s21 = scalar_lea.vmem [#allocation11], %s1058_s13  ;;  %s1346_s13 = scalar_lea.hbm %s1710_s7, 32 }
 0x1d3   : > { %v791_v14 = vpop.f32.mrf.mxu1  ;;  %s933_s22 = sshll.u32 %s352_s21, 4  ;;  %s934_s22 = int_to_ptr.vmem [resolvable:$true] %s933_s22 }
 0x1d4   : > { %v797_v15 = vsel %vm514_vm5, %v791_v14, -inf  ;;  %v1623_v17 = vpop.eup %1236 }
 0x1d5   : > { %798 = vmax.xlane.f32.xlu2 %v797_v15  ;;  %v533_v18 = vpack.c.bf16 %v1623_v17, %v1621_v16  ;;  %v530_v62 = vsel %vm514_vm5, %v1623_v17, 0.0 }
 0x1d7   : > { %1089 = vmatmul.msk.bf16.vlgmr.msrb.gmra.mxu0 %vm514_vm5, %v533_v18 }
 0x1dd   : > { %701 = vmax.xlane.f32.xlu2 %v700_v20 }
 0x1eb   : > { %816 = vrot.lane.b32.xlu1 %v815_v23, %s1419_s12 }
 0x230   : > { %v602_v24 = vpop.xlane.xlu0 %601 }
 0x231   : > { %v606_v25 = vsub.f32 %v595_v59, %v602_v24 }
 0x233   : > { %v608_v26 = vmul.f32 1.442695, %v606_v25 }
 0x235   : > { %v699_v27 = vpop.xlane.xlu1 %698  ;;  %1238 = vpow2.f32 %v608_v26 }
 0x236   : > { %v703_v28 = vsub.f32 %v692_v61, %v699_v27 }
 0x238   : > { %v705_v29 = vmul.f32 1.442695, %v703_v28 }
 0x23a   : > { %1240 = vpow2.f32 %v705_v29 }
 0x23b   : > { %v1239_v30 = vpop.eup %1238 }
 0x23c   : > { %v612_v32 = vsel %vm514_vm5, %v1239_v30, 0.0 }
 0x23d   : > { %v605_v31 = vpop.xlane.xlu1 %604  ;;  %613 = vadd.xlane.f32.xlu2 %v612_v32 }
 0x23e   : > { %v607_v33 = vsub.f32 %v597_v63, %v605_v31 }
 0x240   : > { %v610_v34 = vmul.f32 1.442695, %v607_v33  ;;  %v1241_v35 = vpop.eup %1240 }
 0x241   : > { %v709_v39 = vsel %vm514_vm5, %v1241_v35, 0.0 }
 0x242   : > { %1242 = vpow2.f32 %v610_v34 }
 0x243   : > { %v720_v36 = vpop.permute.xlu0 %719 }
 0x244   : > { %v725_v37 = vsel %vm386_vm0, %v720_v36, 0 }
 0x245   : > { %v796_v38 = vpop.xlane.xlu1 %795  ;;  %734 = vmatpush.bf16.msra.mxu0 %v725_v37  ;;  %710 = vadd.xlane.f32.xlu2 %v709_v39 }
 0x246   : > { %v800_v40 = vsub.f32 %v789_v6, %v796_v38 }
 0x248   : > { %v1243_v41 = vpop.eup %1242  ;;  %v802_v42 = vmul.f32 1.442695, %v800_v40  ;;  %v799_v44 = vpop.xlane.xlu2 %798  ;;  %v1148_v40 = vld [vmem:[%s1708_s5 + $0x18] sm:$0xff] }
 0x249   : > { %v615_v43 = vsel %vm514_vm5, %v1243_v41, 0.0  ;;  %v618_v45 = vpack.c.bf16 %v1243_v41, %v1239_v30  ;;  %v801_v46 = vsub.f32 %v791_v14, %v799_v44  ;;  %906 = vmatpush.bf16.msra.mxu3 %v1148_v40  ;;  %v1147_v41 = vld [vmem:[%s1708_s5 + $0x10] sm:$0xff]  ;;  %v1145_v44 = vld [vmem:[%s1708_s5] sm:$0xff] }
 0x24a   : > { %1244 = vpow2.f32 %v802_v42  ;;  %616 = vadd.xlane.f32.xlu0 %v615_v43  ;;  %v1146_v43 = vld [vmem:[%s1708_s5 + $0x8] sm:$0xff] }
 0x24b   : > { %1095 = vmatmul.msk.bf16.vlgmr.msrb.gmra.mxu2 %vm514_vm5, %v618_v45  ;;  %v804_v51 = vmul.f32 1.442695, %v801_v46 }
 0x24d   : > { %907 = vmatpush.bf16.msra.mxu3 %v1147_v41 }
 0x250   : > { %v1245_v47 = vpop.eup %1244  ;;  %v702_v49 = vpop.xlane.xlu2 %701 }
 0x251   : > { %v806_v48 = vsel %vm514_vm5, %v1245_v47, 0.0  ;;  %v704_v50 = vsub.f32 %v694_v19, %v702_v49  ;;  %908 = vmatpush.bf16.msra.mxu3 %v1146_v43 }
 0x252   : > { %807 = vadd.xlane.f32.xlu1 %v806_v48 }
 0x253   : > { %v707_v52 = vmul.f32 1.442695, %v704_v50  ;;  %v1233_v50 = vld [vmem:[%s1709_s6] ss:$0 sm:$0xff] }
 0x254   : > { %v550_v1 = vpop.f32.mrf.mxu0 }
 0x255   : > { %1246 = vpow2.f32 %v707_v52  ;;  %909 = vmatpush.bf16.msra.mxu3 %v1145_v44 }
 0x256   : > { %1248 = vpow2.f32 %v804_v51 }
 0x25b   : > { %v1247_v53 = vpop.eup %1246 }
 0x25c   : > { %v1249_v54 = vpop.eup %1248  ;;  %v715_v55 = vpack.c.bf16 %v1247_v53, %v1241_v35  ;;  %v712_v57 = vsel %vm514_vm5, %v1247_v53, 0.0  ;;  %v552_v8 = vpop.f32.mrf.mxu0 }
 0x25d   : > { %v817_v56 = vpop.permute.xlu1 %816  ;;  %713 = vadd.xlane.f32.xlu2 %v712_v57  ;;  %v812_v59 = vpack.c.bf16 %v1249_v54, %v1245_v47  ;;  %v809_v61 = vsel %vm514_vm5, %v1249_v54, 0.0 }
 0x25e   : > { %v822_v58 = vsel %vm386_vm0, %v817_v56, 0  ;;  %1101 = vmatmul.msk.bf16.vlgmr.msra.gmra.mxu0 %vm514_vm5, %v715_v55 }
 0x25f   : > { %831 = vmatpush.bf16.msra.mxu2 %v822_v58 }
 0x262   : > { %1107 = vmatmul.msk.bf16.vlgmr.msra.gmra.mxu2 %vm514_vm5, %v812_v59 }
 0x265   : > { %528 = vadd.xlane.f32.xlu2 %v527_v60 }
 0x26d   : > { %810 = vadd.xlane.f32.xlu2 %v809_v61 }
 0x275   : > { %531 = vadd.xlane.f32.xlu2 %v530_v62 }
 0x2b0   : > { %v614_v63 = vpop.xlane.xlu2 %613 }
 0x2b1   : > { %1250 = vrcp.f32 %v614_v63 }
 0x2b7   : > { %v1251_v3 = vpop.eup %1250 }
 0x2b8   : > { %v711_v0 = vpop.xlane.xlu2 %710 }
 0x2bd   : > { %v617_v2 = vpop.xlane.xlu0 %616 }
 0x2be   : > { %1252 = vrcp.f32 %v617_v2 }
 0x2bf   : > { %1254 = vrcp.f32 %v711_v0 }
 0x2c4   : > { %v1253_v9 = vpop.eup %1252 }
 0x2c5   : > { %v1255_v14 = vpop.eup %1254  ;;  %v808_v15 = vpop.xlane.xlu1 %807 }
 0x2ce   : > { %v639_v4 = vpop.f32.mrf.mxu2 }
 0x2cf   : > { %v646_v5 = vmul.f32 %v1251_v3, %v639_v4 }
 0x2d0   : > { %v714_v7 = vpop.xlane.xlu2 %713 }
 0x2d1   : > { %v648_v6 = vpack.c.bf16 %v646_v5, %v646_v5 }
 0x2d3   : > { %652 = vrot.lane.b32.xlu0 %v648_v6, %s1420_s20 }
 0x2d6   : > { %v641_v10 = vpop.f32.mrf.mxu2 }
 0x2d7   : > { %v647_v11 = vmul.f32 %v1253_v9, %v641_v10 }
 0x2d8   : > { %v529_v13 = vpop.xlane.xlu2 %528 }
 0x2d9   : > { %v649_v12 = vpack.c.bf16 %v647_v11, %v647_v11  ;;  %1256 = vrcp.f32 %v529_v13 }
 0x2da   : > { %1258 = vrcp.f32 %v714_v7 }
 0x2db   : > { %654 = vrot.lane.b32.xlu2 %v649_v12, %s1420_s20  ;;  %v736_v16 = vpop.f32.mrf.mxu0  ;;  %1260 = vrcp.f32 %v808_v15  ;;  %s1149_s20 = sshll.u32 %s1404_s27, 4 }
 0x2dc   : > { %v743_v17 = vmul.f32 %v1255_v14, %v736_v16  ;;  %s932_s30 = scalar_lea.hbm %s1710_s7, %s1149_s20 }
 0x2dd   : > { %s935_s8 = sshll.u32 %s932_s30, 4  ;;  %s936_s8 = int_to_ptr.hbm [resolvable:$true] %s935_s8 }
 0x2de   : > { %v745_v18 = vpack.c.bf16 %v743_v17, %v743_v17  ;;  %s1340_s27 = sshra.s32 %s936_s8, 4  ;;  %s1341_s27 = int_to_ptr.hbm [resolvable:$true] %s1340_s27 }
 0x2df   : > { %v1257_v19 = vpop.eup %1256  ;;  %s1342_s19 = scalar_lea.hbm %s1341_s27, 16  ;;  %p1347_p11 = scmp.lt.s32.totalorder %s1341_s27, %s1710_s7 }
 0x2e0   : > { %v557_v20 = vmul.f32 %v1257_v19, %v550_v1  ;;  %v811_v21 = vpop.xlane.xlu2 %810  ;;  %749 = vrot.lane.b32.xlu1 %v745_v18, %s1421_s11  ;;  %v1259_v23 = vpop.eup %1258  ;;  %p1343_p1 = scmp.ne.s32.totalorder %s1341_s27, %s1342_s19  ;;  %p1348_p12 = scmp.lt.s32.totalorder %s1346_s13, %s1342_s19 }
 0x2e1   : > { %v1261_v25 = vpop.eup %1260  ;;  %1262 = vrcp.f32 %v811_v21 }
 0x2e2   : > { %v559_v22 = vpack.c.bf16 %v557_v20, %v557_v20  ;;  %p1344_p9 = pnand %p1343_p1, %p1536_p4  ;;  %p1349_p13 = por %p1348_p12, %p1347_p11 }
 0x2e3   : > { %v738_v24 = vpop.f32.mrf.mxu0 }
 0x2e4   : > { %v744_v26 = vmul.f32 %v1259_v23, %v738_v24  ;;  %562 = vst.msk [vmem:[#allocation5] sm:$0xf] %vm561_vm6, %v559_v22  ;;  %p1345_p10 = pneg %p1344_p9 }
 0x2e5   : > { %v833_v27 = vpop.f32.mrf.mxu2 }
 0x2e6   : > { %v840_v28 = vmul.f32 %v1261_v25, %v833_v27  ;;  %v746_v29 = vpack.c.bf16 %v744_v26, %v744_v26  ;;  %p1350_p0 = pnand %p1349_p13, %p1345_p10 }
 0x2e7   : > { %v1263_v32 = vpop.eup %1262 }
 0x2e8   : > { %v842_v30 = vpack.c.bf16 %v840_v28, %v840_v28  ;;  %v532_v31 = vpop.xlane.xlu2 %531  ;;  %751 = vrot.lane.b32.xlu0 %v746_v29, %s1421_s11 }
 0x2e9   : > { %1264 = vrcp.f32 %v532_v31 }
 0x2ea   : > { %846 = vrot.lane.b32.xlu2 %v842_v30, %s1422_s16 }
 0x2ed   : > { %v835_v33 = vpop.f32.mrf.mxu2 }
 0x2ee   : > { %v841_v34 = vmul.f32 %v1263_v32, %v835_v33 }
 0x2ef   : > { %v1265_v35 = vpop.eup %1264 }
 0x2f0   : > { %v843_v36 = vpack.c.bf16 %v841_v34, %v841_v34  ;;  %v558_v37 = vmul.f32 %v1265_v35, %v552_v8 }
 0x2f2   : > { %848 = vrot.lane.b32.xlu0 %v843_v36, %s1422_s16  ;;  %v560_v38 = vpack.c.bf16 %v558_v37, %v558_v37 }
 0x2f4   : > { %563 = vst.msk [vmem:[#allocation5 + $0x4] sm:$0xf] %vm561_vm6, %v560_v38 }
 0x335   : > { %v655_v39 = vpop.permute.xlu2 %654 }
 0x336   : > { %660 = vst.msk [vmem:[#allocation5 + $0x4] sm:$0xf] %vm658_vm7, %v655_v39 }
 0x344   : > { %v847_v46 = vpop.permute.xlu2 %846 }
 0x345   : > { %v653_v42 = vpop.permute.xlu0 %652 }
 0x346   : > { %659 = vst.msk [vmem:[#allocation5] sm:$0xf] %vm658_vm7, %v653_v42 }
 0x352   : > { %v750_v45 = vpop.permute.xlu1 %749 }
 0x353   : > { %756 = vst.msk [vmem:[#allocation5] sm:$0xf] %vm755_vm8, %v750_v45 }
 0x354   : > { %853 = vst.msk [vmem:[#allocation5] sm:$0xf] %vm852_vm9, %v847_v46 }
 0x35a   : > { %v752_v47 = vpop.permute.xlu0 %751 }
 0x35b   : > { %757 = vst.msk [vmem:[#allocation5 + $0x4] sm:$0xf] %vm755_vm8, %v752_v47 }
 0x364   : > { %v849_v48 = vpop.permute.xlu0 %848 }
 0x365   : > { %854 = vst.msk [vmem:[#allocation5 + $0x4] sm:$0xf] %vm852_vm9, %v849_v48 }
 0x36c   : > { %v1144_v49 = vld [vmem:[#allocation5] sm:$0xff] }
 0x36d   : > { %1128 = vmatmul.msk.bf16.vlgmr.msra.gmra.mxu3 %vm898_vm10, %v1144_v49 }
 0x3f0   : > { %v911_v51 = vpop.f32.mrf.mxu3 }
 0x3f1   : > { %v912_v52 = vadd.f32 %v1233_v50, %v911_v51 }
 0x3f3   : > { %916 = vst.msk [vmem:[%s352_s21] sm:$0xff] %vm459_vm1, %v912_v52 }
 0x3f8   : > { %v913_v53 = vpop.f32.mrf.mxu3 }
 0x3f9   : > { %v914_v54 = vadd.f32 %v1233_v50, %v913_v53 }
 0x3fb   : > { %917 = vst.msk [vmem:[%s352_s21 + $0x8] sm:$0xff] %vm459_vm1, %v914_v54 }
 0x3fc   : > { %1353 = shalt.err (!%p1350_p0)
}
 0x3fd   : > { %s1423_s18 = smov 128   ;;  %s1424_s20 = smov 8  }
 0x3fe   : > { %1156 = dma.vmem_to_hbm [thread:$0]  (%p1536_p4), %s934_s22, 256, %s936_s8, %s919_s17, %s1423_s18, %s1423_s18, %s1424_s20  }
 0x3ff PF: > { %s950_s11 = sand.u32 1, %s1392_s24   ;;  %p1167_p2 = pnand %p1052_p6, %p1544_p7 }
 0x400   : > { %s951_s16 = scalar_lea.sflag [#allocation8], %s950_s11 }
 0x401   : > { %p1168_p5 = pneg %p1167_p2 }
 0x403   : > { %1387 = dma.done.wait (%p1168_p5), %s951_s16, 256  }
 0x404   : > { %1389 = vsyncadd (%p1168_p5), %s951_s16, 4294967040  ;;  %s24_s29 = sadd.s32 1, %s1412_s29   ;;  %s1721_s23 = sld [smem:[#allocation15_spill]] }
 0x405   : > { %p21_p8 = scmp.ge.s32.totalorder %s24_s29, 4   ;;  %s1722_s24 = smov %s1396_s25 }
 0x406   : > { %s1723_s25 = smov %s1400_s26  ;;  %s1724_s26 = smov %s1542_s9 }
 0x407   : > { %s1725_s27 = smov %s1408_s28  ;;  %23 = sbr.rel (!%p21_p8) target bundleno = 9 (0x9), region = 104 }
 0x40a   : > { %s1726_s28 = smov %s1721_s23 }
 0x40c   :  { %957 = vsyncpa [#allocation7], 1 }
 0x40d   :  { %959 = vsyncpa [#allocation7 + $0x1], 1 }
 0x40e   :  { %960 = vsyncpa [#allocation10], 1 }
 0x40f   :  { %961 = vsyncpa [#allocation8], 1 }
 0x410   :  { %963 = vsyncpa [#allocation8 + $0x1], 1 }

</bundles_post_ra>
